<compile_context>
chip_gen: v7x
topology: tpu7x:2x2x1
jax: 0.10.0
libtpu: 0.0.40
codegen_flags: <defaults>
</compile_context>

<pallas_src>
import functools

import jax
import jax.numpy as jnp
from jax import lax
from jax.experimental import pallas as pl
from jax.experimental.pallas import tpu as pltpu


_NEG_INF = -1e30  # finite "minus infinity" to keep inf/nan out of the online softmax


def _sa_block_kernel(
    gamma_ref,                     # SMEM scalar prefetch, shape (1,)
    wq_ref, bq_ref,                # (C8, C), (C8, 1)
    wk_ref, bk_ref,                # (C8, C), (C8, 1)
    wv_ref, bv_ref,                # (C,  C), (C,  1)
    xq_ref,                        # (1, C, t)  query-position tile of x
    xkv_ref,                       # (1, C, t)  key/value-position tile of x
    o_ref,                         # (1, C, t)
    q_sc,                          # VMEM (C8, t) f32 : projected query tile
    m_sc,                          # VMEM (1, t)  f32 : running max
    l_sc,                          # VMEM (1, t)  f32 : running denominator
    acc_sc,                        # VMEM (C, t)  f32 : running numerator
    *,
    hw, tile,
):
    ki = pl.program_id(2)
    n_kv = pl.num_programs(2)

    @pl.when(ki == 0)
    def _init():
        # Project the query tile once per (batch, q_tile); resident in scratch after.
        xq = xq_ref[0]                                                # (C, t)
        q = jnp.dot(wq_ref[...], xq, preferred_element_type=jnp.float32)
        q_sc[...] = q + bq_ref[...].astype(jnp.float32)               # (C8, t)
        m_sc[...] = jnp.full_like(m_sc, _NEG_INF)
        l_sc[...] = jnp.zeros_like(l_sc)
        acc_sc[...] = jnp.zeros_like(acc_sc)

    # Project the key/value tile (1x1 convs == matmuls over channels).
    xkv = xkv_ref[0]                                                  # (C, t)
    k = jnp.dot(wk_ref[...], xkv, preferred_element_type=jnp.float32)
    k = k + bk_ref[...].astype(jnp.float32)                           # (C8, t)
    v = jnp.dot(wv_ref[...], xkv, preferred_element_type=jnp.float32)
    v = v + bv_ref[...].astype(jnp.float32)                           # (C, t)

    # energy^T[j, i] = sum_c K[c, j] * Q[c, i] -> (t_kv, t_q); contraction over the
    # channel dim via dot_general, no materialized transpose.
    e_t = lax.dot_general(k, q_sc[...], (((0,), (0,)), ((), ())),
                          preferred_element_type=jnp.float32)

    if hw % tile != 0:
        # Mask padded kv positions (statically skipped when HW is a tile multiple).
        j = ki * tile + lax.broadcasted_iota(jnp.int32, e_t.shape, 0)
        e_t = jnp.where(j < hw, e_t, _NEG_INF)

    # Online softmax over the kv axis (axis 0 of e_t); stats broadcast along lanes.
    m_prev = m_sc[...]
    m_new = jnp.maximum(m_prev, jnp.max(e_t, axis=0, keepdims=True))  # (1, t)
    alpha = jnp.exp(m_prev - m_new)                                   # (1, t)
    p = jnp.exp(e_t - m_new)                                          # (t_kv, t_q)
    l_sc[...] = alpha * l_sc[...] + jnp.sum(p, axis=0, keepdims=True)
    acc_sc[...] = alpha * acc_sc[...] + jnp.dot(
        v, p, preferred_element_type=jnp.float32)                     # (C, t_q)
    m_sc[...] = m_new

    @pl.when(ki == n_kv - 1)
    def _finalize():
        inv_l = pl.reciprocal(l_sc[...], approx=True)                 # (1, t)
        out = acc_sc[...] * inv_l                                     # (C, t)
        o_ref[0] = (gamma_ref[0] * out + xq_ref[0]).astype(o_ref.dtype)


def sa_block(x, wq, bq, wk, bk, wv, bv, gamma, *, tile=128):
    """SA_Block forward. x: (B, C, H, W); wq/wk: (C//8, C); bq/bk: (C//8,);
    wv: (C, C); bv: (C,); gamma: scalar. Returns gamma * SA(x) + x, shape (B, C, H, W)."""
    B, C, H, W = x.shape
    C8 = wq.shape[0]
    HW = H * W
    n_tiles = -(-HW // tile)                      # cdiv
    HW_pad = n_tiles * tile

    x_flat = x.reshape(B, C, HW)
    if HW_pad != HW:
        x_flat = jnp.pad(x_flat, ((0, 0), (0, 0), (0, HW_pad - HW)))

    gamma_arr = jnp.asarray(gamma, jnp.float32).reshape(1)
    bq2 = bq.reshape(C8, 1)
    bk2 = bk.reshape(C8, 1)
    bv2 = bv.reshape(C, 1)

    kernel = functools.partial(_sa_block_kernel, hw=HW, tile=tile)

    itemsize = jnp.dtype(x.dtype).itemsize
    cost = pl.CostEstimate(
        flops=int(2 * B * HW * HW * (C8 + C) + 2 * B * HW * C * (2 * C8 + C)),
        transcendentals=int(B * HW * HW),
        bytes_accessed=int((n_tiles + 2) * B * C * HW_pad * itemsize),
    )

    out_flat = pl.pallas_call(
        kernel,
        out_shape=jax.ShapeDtypeStruct((B, C, HW_pad), x.dtype),
        grid_spec=pltpu.PrefetchScalarGridSpec(
            num_scalar_prefetch=1,                # gamma lives in SMEM
            grid=(B, n_tiles, n_tiles),           # (batch, q tiles, kv tiles)
            in_specs=[
                pl.BlockSpec((C8, C), lambda b, qi, ki, g: (0, 0)),       # Wq
                pl.BlockSpec((C8, 1), lambda b, qi, ki, g: (0, 0)),       # bq
                pl.BlockSpec((C8, C), lambda b, qi, ki, g: (0, 0)),       # Wk
                pl.BlockSpec((C8, 1), lambda b, qi, ki, g: (0, 0)),       # bk
                pl.BlockSpec((C, C), lambda b, qi, ki, g: (0, 0)),        # Wv
                pl.BlockSpec((C, 1), lambda b, qi, ki, g: (0, 0)),        # bv
                pl.BlockSpec((1, C, tile), lambda b, qi, ki, g: (b, 0, qi)),  # x (q tile)
                pl.BlockSpec((1, C, tile), lambda b, qi, ki, g: (b, 0, ki)),  # x (kv tile)
            ],
            out_specs=pl.BlockSpec((1, C, tile), lambda b, qi, ki, g: (b, 0, qi)),
            scratch_shapes=[
                pltpu.VMEM((C8, tile), jnp.float32),   # q tile
                pltpu.VMEM((1, tile), jnp.float32),    # running max
                pltpu.VMEM((1, tile), jnp.float32),    # running denom
                pltpu.VMEM((C, tile), jnp.float32),    # accumulator
            ],
        ),
        compiler_params=pltpu.CompilerParams(
            dimension_semantics=("parallel", "parallel", "arbitrary"),
            vmem_limit_bytes=32 * 1024 * 1024,
        ),
        cost_estimate=cost,
    )(gamma_arr, wq, bq2, wk, bk2, wv, bv2, x_flat, x_flat)

    if HW_pad != HW:
        out_flat = out_flat[:, :, :HW]
    return out_flat.reshape(B, C, H, W)


def _reference(x, wq, bq, wk, bk, wv, bv, gamma):
    """Plain-JAX mirror of the PyTorch SA_Block forward."""
    B, C, H, W = x.shape
    HW = H * W
    xf = x.reshape(B, C, HW)
    q = jnp.einsum("oc,bcn->bon", wq, xf) + bq[None, :, None]   # (B, C/8, HW)
    k = jnp.einsum("oc,bcn->bon", wk, xf) + bk[None, :, None]   # (B, C/8, HW)
    v = jnp.einsum("oc,bcn->bon", wv, xf) + bv[None, :, None]   # (B, C,   HW)
    energy = jnp.einsum("bci,bcj->bij", q, k)                   # (B, HW, HW)
    attn = jax.nn.softmax(energy, axis=-1)
    out = jnp.einsum("bcj,bij->bci", v, attn)                   # (B, C, HW)
    out = out.reshape(B, C, H, W)
    return gamma * out + x


if __name__ == "__main__":
    key = jax.random.PRNGKey(0)
    B, C, H, W = 2, 16, 16, 16          # small shapes consistent with the module
    C8 = C // 8
    ks = jax.random.split(key, 7)

    x = jax.random.normal(ks[0], (B, C, H, W), dtype=jnp.float32)
    wq = jax.random.normal(ks[1], (C8, C), dtype=jnp.float32) * 0.1
    bq = jax.random.normal(ks[2], (C8,), dtype=jnp.float32) * 0.1
    wk = jax.random.normal(ks[3], (C8, C), dtype=jnp.float32) * 0.1
    bk = jax.random.normal(ks[4], (C8,), dtype=jnp.float32) * 0.1
    wv = jax.random.normal(ks[5], (C, C), dtype=jnp.float32) * 0.1
    bv = jax.random.normal(ks[6], (C,), dtype=jnp.float32) * 0.1
    gamma = jnp.float32(1.0)            # nn.Parameter(torch.ones(1)) — deterministic init

    out = sa_block(x, wq, bq, wk, bk, wv, bv, gamma)
    out = jax.block_until_ready(out)

    ref = _reference(x, wq, bq, wk, bk, wv, bv, gamma)
    assert out.shape == (B, C, H, W)
    # tolerance accounts for the approx EUP reciprocal in the softmax denominator
    assert jnp.allclose(out, ref, atol=1e-2, rtol=1e-2), "mismatch vs reference"

    print("KERNEL_OK")
</pallas_src>

<mosaic_0001>
module attributes {stable_mosaic.version = 11 : i64} {
  func.func @_sa_block_kernel(%arg0: i32, %arg1: i32, %arg2: i32, %arg3: memref<1xf32, #tpu.memory_space<smem>>, %arg4: memref<2x16xf32, #tpu.memory_space<vmem>>, %arg5: memref<2x1xf32, #tpu.memory_space<vmem>>, %arg6: memref<2x16xf32, #tpu.memory_space<vmem>>, %arg7: memref<2x1xf32, #tpu.memory_space<vmem>>, %arg8: memref<16x16xf32, #tpu.memory_space<vmem>>, %arg9: memref<16x1xf32, #tpu.memory_space<vmem>>, %arg10: memref<1x16x128xf32, #tpu.memory_space<vmem>>, %arg11: memref<1x16x128xf32, #tpu.memory_space<vmem>>, %arg12: memref<1x16x128xf32, #tpu.memory_space<vmem>>, %arg13: memref<2x128xf32, #tpu.memory_space<vmem>>, %arg14: memref<1x128xf32, #tpu.memory_space<vmem>>, %arg15: memref<1x128xf32, #tpu.memory_space<vmem>>, %arg16: memref<16x128xf32, #tpu.memory_space<vmem>>) attributes {dimension_semantics = [#tpu.dimension_semantics<parallel>, #tpu.dimension_semantics<parallel>, #tpu.dimension_semantics<arbitrary>], iteration_bounds = array<i64: 2, 2, 2>, scalar_prefetch = 1 : i64, scratch_operands = 4 : i64, tpu.core_type = #tpu.core_type<tc>, window_params = [{pipeline_mode = #tpu.pipeline_mode<synchronous>, transform_indices = @transform_0, window_bounds = array<i64: 2, 16>}, {pipeline_mode = #tpu.pipeline_mode<synchronous>, transform_indices = @transform_1, window_bounds = array<i64: 2, 1>}, {pipeline_mode = #tpu.pipeline_mode<synchronous>, transform_indices = @transform_2, window_bounds = array<i64: 2, 16>}, {pipeline_mode = #tpu.pipeline_mode<synchronous>, transform_indices = @transform_3, window_bounds = array<i64: 2, 1>}, {pipeline_mode = #tpu.pipeline_mode<synchronous>, transform_indices = @transform_4, window_bounds = array<i64: 16, 16>}, {pipeline_mode = #tpu.pipeline_mode<synchronous>, transform_indices = @transform_5, window_bounds = array<i64: 16, 1>}, {transform_indices = @transform_6, window_bounds = array<i64: 1, 16, 128>}, {transform_indices = @transform_7, window_bounds = array<i64: 1, 16, 128>}, {transform_indices = @transform_8, window_bounds = array<i64: 1, 16, 128>}]} {
    %c0_i32 = arith.constant 0 : i32
    %0 = arith.cmpi eq, %arg2, %c0_i32 : i32
    %1 = arith.extui %0 : i1 to i32
    %c0_i32_0 = arith.constant 0 : i32
    %2 = arith.cmpi ne, %1, %c0_i32_0 : i32
    scf.if %2 {
      %c0_31 = arith.constant 0 : index
      %c0_32 = arith.constant 0 : index
      %c0_33 = arith.constant 0 : index
      %42 = vector.load %arg10[%c0_31, %c0_32, %c0_33] : memref<1x16x128xf32, #tpu.memory_space<vmem>>, vector<1x16x128xf32>
      %43 = vector.shape_cast %42 : vector<1x16x128xf32> to vector<16x128xf32>
      %c0_34 = arith.constant 0 : index
      %c0_35 = arith.constant 0 : index
      %44 = vector.load %arg4[%c0_34, %c0_35] : memref<2x16xf32, #tpu.memory_space<vmem>>, vector<2x16xf32>
      %cst_36 = arith.constant dense<0.000000e+00> : vector<2x128xf32>
      %45 = tpu.matmul %44, %43, %cst_36 {dimension_numbers = #tpu.dot_dimension_numbers<[1], [0], [0], [1], [0, 0, 1, 1], [], []>} : vector<2x16xf32>, vector<16x128xf32>, vector<2x128xf32> -> vector<2x128xf32>
      %c0_37 = arith.constant 0 : index
      %c0_38 = arith.constant 0 : index
      %46 = vector.load %arg5[%c0_37, %c0_38] : memref<2x1xf32, #tpu.memory_space<vmem>>, vector<2x1xf32>
      %47 = vector.broadcast %46 : vector<2x1xf32> to vector<2x128xf32>
      %48 = arith.addf %45, %47 : vector<2x128xf32>
      %c0_39 = arith.constant 0 : index
      %c0_40 = arith.constant 0 : index
      %49 = vector.load %arg13[%c0_39, %c0_40] : memref<2x128xf32, #tpu.memory_space<vmem>>, vector<2x128xf32>
      tpu.vector_store %arg13[%c0_39, %c0_40], %48 {strides = array<i32>} : memref<2x128xf32, #tpu.memory_space<vmem>>, vector<2x128xf32>,
      %cst_41 = arith.constant -1.000000e+30 : f32
      %50 = vector.broadcast %cst_41 : f32 to vector<1x128xf32>
      %c0_42 = arith.constant 0 : index
      %c0_43 = arith.constant 0 : index
      %51 = vector.load %arg14[%c0_42, %c0_43] : memref<1x128xf32, #tpu.memory_space<vmem>>, vector<1x128xf32>
      tpu.vector_store %arg14[%c0_42, %c0_43], %50 {strides = array<i32>} : memref<1x128xf32, #tpu.memory_space<vmem>>, vector<1x128xf32>,
      %cst_44 = arith.constant 0.000000e+00 : f32
      %52 = vector.broadcast %cst_44 : f32 to vector<1x128xf32>
      %c0_45 = arith.constant 0 : index
      %c0_46 = arith.constant 0 : index
      %53 = vector.load %arg15[%c0_45, %c0_46] : memref<1x128xf32, #tpu.memory_space<vmem>>, vector<1x128xf32>
      tpu.vector_store %arg15[%c0_45, %c0_46], %52 {strides = array<i32>} : memref<1x128xf32, #tpu.memory_space<vmem>>, vector<1x128xf32>,
      %cst_47 = arith.constant 0.000000e+00 : f32
      %54 = vector.broadcast %cst_47 : f32 to vector<16x128xf32>
      %c0_48 = arith.constant 0 : index
      %c0_49 = arith.constant 0 : index
      %55 = vector.load %arg16[%c0_48, %c0_49] : memref<16x128xf32, #tpu.memory_space<vmem>>, vector<16x128xf32>
      tpu.vector_store %arg16[%c0_48, %c0_49], %54 {strides = array<i32>} : memref<16x128xf32, #tpu.memory_space<vmem>>, vector<16x128xf32>,
    } else {
    }
    %c0 = arith.constant 0 : index
    %c0_1 = arith.constant 0 : index
    %c0_2 = arith.constant 0 : index
    %3 = vector.load %arg11[%c0, %c0_1, %c0_2] : memref<1x16x128xf32, #tpu.memory_space<vmem>>, vector<1x16x128xf32>
    %4 = vector.shape_cast %3 : vector<1x16x128xf32> to vector<16x128xf32>
    %c0_3 = arith.constant 0 : index
    %c0_4 = arith.constant 0 : index
    %5 = vector.load %arg6[%c0_3, %c0_4] : memref<2x16xf32, #tpu.memory_space<vmem>>, vector<2x16xf32>
    %cst = arith.constant dense<0.000000e+00> : vector<2x128xf32>
    %6 = tpu.matmul %5, %4, %cst {dimension_numbers = #tpu.dot_dimension_numbers<[1], [0], [0], [1], [0, 0, 1, 1], [], []>} : vector<2x16xf32>, vector<16x128xf32>, vector<2x128xf32> -> vector<2x128xf32>
    %c0_5 = arith.constant 0 : index
    %c0_6 = arith.constant 0 : index
    %7 = vector.load %arg7[%c0_5, %c0_6] : memref<2x1xf32, #tpu.memory_space<vmem>>, vector<2x1xf32>
    %8 = vector.broadcast %7 : vector<2x1xf32> to vector<2x128xf32>
    %9 = arith.addf %6, %8 : vector<2x128xf32>
    %c0_7 = arith.constant 0 : index
    %c0_8 = arith.constant 0 : index
    %10 = vector.load %arg8[%c0_7, %c0_8] : memref<16x16xf32, #tpu.memory_space<vmem>>, vector<16x16xf32>
    %cst_9 = arith.constant dense<0.000000e+00> : vector<16x128xf32>
    %11 = tpu.matmul %10, %4, %cst_9 {dimension_numbers = #tpu.dot_dimension_numbers<[1], [0], [0], [1], [0, 0, 1, 1], [], []>} : vector<16x16xf32>, vector<16x128xf32>, vector<16x128xf32> -> vector<16x128xf32>
    %c0_10 = arith.constant 0 : index
    %c0_11 = arith.constant 0 : index
    %12 = vector.load %arg9[%c0_10, %c0_11] : memref<16x1xf32, #tpu.memory_space<vmem>>, vector<16x1xf32>
    %13 = vector.broadcast %12 : vector<16x1xf32> to vector<16x128xf32>
    %14 = arith.addf %11, %13 : vector<16x128xf32>
    %c0_12 = arith.constant 0 : index
    %c0_13 = arith.constant 0 : index
    %15 = vector.load %arg13[%c0_12, %c0_13] : memref<2x128xf32, #tpu.memory_space<vmem>>, vector<2x128xf32>
    %cst_14 = arith.constant dense<0.000000e+00> : vector<128x128xf32>
    %16 = tpu.matmul %9, %15, %cst_14 {dimension_numbers = #tpu.dot_dimension_numbers<[0], [0], [1], [1], [0, 1, 1, 1], [], []>} : vector<2x128xf32>, vector<2x128xf32>, vector<128x128xf32> -> vector<128x128xf32>
    %c0_15 = arith.constant 0 : index
    %c0_16 = arith.constant 0 : index
    %17 = vector.load %arg14[%c0_15, %c0_16] : memref<1x128xf32, #tpu.memory_space<vmem>>, vector<1x128xf32>
    %cst_17 = arith.constant dense<0xFF800000> : vector<128xf32>
    %18 = vector.multi_reduction <maximumf>, %16, %cst_17 [0] : vector<128x128xf32> to vector<128xf32>
    %19 = vector.shape_cast %18 : vector<128xf32> to vector<1x128xf32>
    %20 = arith.maximumf %17, %19 : vector<1x128xf32>
    %21 = arith.subf %17, %20 : vector<1x128xf32>
    %22 = math.exp %21 : vector<1x128xf32>
    %23 = vector.broadcast %20 : vector<1x128xf32> to vector<128x128xf32>
    %24 = arith.subf %16, %23 : vector<128x128xf32>
    %25 = math.exp %24 : vector<128x128xf32>
    %c0_18 = arith.constant 0 : index
    %c0_19 = arith.constant 0 : index
    %26 = vector.load %arg15[%c0_18, %c0_19] : memref<1x128xf32, #tpu.memory_space<vmem>>, vector<1x128xf32>
    %27 = arith.mulf %22, %26 : vector<1x128xf32>
    %cst_20 = arith.constant dense<0.000000e+00> : vector<128xf32>
    %28 = vector.multi_reduction <add>, %25, %cst_20 [0] : vector<128x128xf32> to vector<128xf32>
    %29 = vector.shape_cast %28 : vector<128xf32> to vector<1x128xf32>
    %30 = arith.addf %27, %29 : vector<1x128xf32>
    %c0_21 = arith.constant 0 : index
    %c0_22 = arith.constant 0 : index
    %31 = vector.load %arg15[%c0_21, %c0_22] : memref<1x128xf32, #tpu.memory_space<vmem>>, vector<1x128xf32>
    tpu.vector_store %arg15[%c0_21, %c0_22], %30 {strides = array<i32>} : memref<1x128xf32, #tpu.memory_space<vmem>>, vector<1x128xf32>,
    %c0_23 = arith.constant 0 : index
    %c0_24 = arith.constant 0 : index
    %32 = vector.load %arg16[%c0_23, %c0_24] : memref<16x128xf32, #tpu.memory_space<vmem>>, vector<16x128xf32>
    %33 = vector.broadcast %22 : vector<1x128xf32> to vector<16x128xf32>
    %34 = arith.mulf %33, %32 : vector<16x128xf32>
    %cst_25 = arith.constant dense<0.000000e+00> : vector<16x128xf32>
    %35 = tpu.matmul %14, %25, %cst_25 {dimension_numbers = #tpu.dot_dimension_numbers<[1], [0], [0], [1], [0, 0, 1, 1], [], []>} : vector<16x128xf32>, vector<128x128xf32>, vector<16x128xf32> -> vector<16x128xf32>
    %36 = arith.addf %34, %35 : vector<16x128xf32>
    %c0_26 = arith.constant 0 : index
    %c0_27 = arith.constant 0 : index
    %37 = vector.load %arg16[%c0_26, %c0_27] : memref<16x128xf32, #tpu.memory_space<vmem>>, vector<16x128xf32>
    tpu.vector_store %arg16[%c0_26, %c0_27], %36 {strides = array<i32>} : memref<16x128xf32, #tpu.memory_space<vmem>>, vector<16x128xf32>,
    %c0_28 = arith.constant 0 : index
    %c0_29 = arith.constant 0 : index
    %38 = vector.load %arg14[%c0_28, %c0_29] : memref<1x128xf32, #tpu.memory_space<vmem>>, vector<1x128xf32>
    tpu.vector_store %arg14[%c0_28, %c0_29], %20 {strides = array<i32>} : memref<1x128xf32, #tpu.memory_space<vmem>>, vector<1x128xf32>,
    %c1_i32 = arith.constant 1 : i32
    %39 = arith.cmpi eq, %arg2, %c1_i32 : i32
    %40 = arith.extui %39 : i1 to i32
    %c0_i32_30 = arith.constant 0 : i32
    %41 = arith.cmpi ne, %40, %c0_i32_30 : i32
    scf.if %41 {
      %c0_31 = arith.constant 0 : index
      %c0_32 = arith.constant 0 : index
      %42 = vector.load %arg15[%c0_31, %c0_32] : memref<1x128xf32, #tpu.memory_space<vmem>>, vector<1x128xf32>
      %43 = tpu.reciprocal %42 {approx = true} : vector<1x128xf32> -> vector<1x128xf32>
      %c0_33 = arith.constant 0 : index
      %c0_34 = arith.constant 0 : index
      %44 = vector.load %arg16[%c0_33, %c0_34] : memref<16x128xf32, #tpu.memory_space<vmem>>, vector<16x128xf32>
      %45 = vector.broadcast %43 : vector<1x128xf32> to vector<16x128xf32>
      %46 = arith.mulf %44, %45 : vector<16x128xf32>
      %c0_35 = arith.constant 0 : index
      %47 = memref.load %arg3[%c0_35] : memref<1xf32, #tpu.memory_space<smem>>
      %48 = vector.broadcast %47 : f32 to vector<16x128xf32>
      %49 = arith.mulf %48, %46 : vector<16x128xf32>
      %c0_36 = arith.constant 0 : index
      %c0_37 = arith.constant 0 : index
      %c0_38 = arith.constant 0 : index
      %50 = vector.load %arg10[%c0_36, %c0_37, %c0_38] : memref<1x16x128xf32, #tpu.memory_space<vmem>>, vector<1x16x128xf32>
      %51 = vector.shape_cast %50 : vector<1x16x128xf32> to vector<16x128xf32>
      %52 = arith.addf %49, %51 : vector<16x128xf32>
      %c0_39 = arith.constant 0 : index
      %c0_40 = arith.constant 0 : index
      %c0_41 = arith.constant 0 : index
      %53 = vector.load %arg12[%c0_39, %c0_40, %c0_41] : memref<1x16x128xf32, #tpu.memory_space<vmem>>, vector<1x16x128xf32>
      %54 = vector.shape_cast %53 : vector<1x16x128xf32> to vector<16x128xf32>
      %55 = vector.shape_cast %52 : vector<16x128xf32> to vector<1x16x128xf32>
      tpu.vector_store %arg12[%c0_39, %c0_40, %c0_41], %55 {strides = array<i32>} : memref<1x16x128xf32, #tpu.memory_space<vmem>>, vector<1x16x128xf32>,
    } else {
    }
    return
  }
  func.func @transform_0(%arg0: i32, %arg1: i32, %arg2: i32, %arg3: memref<1xf32, #tpu.memory_space<smem>>) -> (i32, i32) {
    %c0_i32 = arith.constant 0 : i32
    %c0_i32_0 = arith.constant 0 : i32
    %c0_i32_1 = arith.constant 0 : i32
    return %c0_i32, %c0_i32_0 : i32, i32
  }
  func.func @transform_1(%arg0: i32, %arg1: i32, %arg2: i32, %arg3: memref<1xf32, #tpu.memory_space<smem>>) -> (i32, i32) {
    %c0_i32 = arith.constant 0 : i32
    %c0_i32_0 = arith.constant 0 : i32
    %c0_i32_1 = arith.constant 0 : i32
    return %c0_i32, %c0_i32_0 : i32, i32
  }
  func.func @transform_2(%arg0: i32, %arg1: i32, %arg2: i32, %arg3: memref<1xf32, #tpu.memory_space<smem>>) -> (i32, i32) {
    %c0_i32 = arith.constant 0 : i32
    %c0_i32_0 = arith.constant 0 : i32
    %c0_i32_1 = arith.constant 0 : i32
    return %c0_i32, %c0_i32_0 : i32, i32
  }
  func.func @transform_3(%arg0: i32, %arg1: i32, %arg2: i32, %arg3: memref<1xf32, #tpu.memory_space<smem>>) -> (i32, i32) {
    %c0_i32 = arith.constant 0 : i32
    %c0_i32_0 = arith.constant 0 : i32
    %c0_i32_1 = arith.constant 0 : i32
    return %c0_i32, %c0_i32_0 : i32, i32
  }
  func.func @transform_4(%arg0: i32, %arg1: i32, %arg2: i32, %arg3: memref<1xf32, #tpu.memory_space<smem>>) -> (i32, i32) {
    %c0_i32 = arith.constant 0 : i32
    %c0_i32_0 = arith.constant 0 : i32
    %c0_i32_1 = arith.constant 0 : i32
    return %c0_i32, %c0_i32_0 : i32, i32
  }
  func.func @transform_5(%arg0: i32, %arg1: i32, %arg2: i32, %arg3: memref<1xf32, #tpu.memory_space<smem>>) -> (i32, i32) {
    %c0_i32 = arith.constant 0 : i32
    %c0_i32_0 = arith.constant 0 : i32
    %c0_i32_1 = arith.constant 0 : i32
    return %c0_i32, %c0_i32_0 : i32, i32
  }
  func.func @transform_6(%arg0: i32, %arg1: i32, %arg2: i32, %arg3: memref<1xf32, #tpu.memory_space<smem>>) -> (i32, i32, i32) {
    %c0_i32 = arith.constant 0 : i32
    %c0_i32_0 = arith.constant 0 : i32
    return %arg0, %c0_i32, %arg1 : i32, i32, i32
  }
  func.func @transform_7(%arg0: i32, %arg1: i32, %arg2: i32, %arg3: memref<1xf32, #tpu.memory_space<smem>>) -> (i32, i32, i32) {
    %c0_i32 = arith.constant 0 : i32
    %c0_i32_0 = arith.constant 0 : i32
    return %arg0, %c0_i32, %arg2 : i32, i32, i32
  }
  func.func @transform_8(%arg0: i32, %arg1: i32, %arg2: i32, %arg3: memref<1xf32, #tpu.memory_space<smem>>) -> (i32, i32, i32) {
    %c0_i32 = arith.constant 0 : i32
    %c0_i32_0 = arith.constant 0 : i32
    return %arg0, %c0_i32, %arg1 : i32, i32, i32
  }
}

</mosaic_0001>

<bundles_post_ra>
// kernel: tpu_custom_call.1
= control target key start
LH: loop header
LB: loop body
LE: loop exit
PB: predicated region body
PF: predicated region fallthrough
CT: control target
= control target key end

     0   :  { %s2374_s0 = inlined_call_operand.<no memory space> [shape: f32[1], index: 0, kind: input, shape index: {}]   ;;  %s2375_s1 = inlined_call_operand.vmem [shape: f32[2,16], index: 1, kind: input, shape index: {}]   ;;  %s2376_s2 = inlined_call_operand.vmem [shape: f32[2,1], index: 2, kind: input, shape index: {}]   ;;  %s2377_s3 = inlined_call_operand.vmem [shape: f32[2,16], index: 3, kind: input, shape index: {}]   ;;  %s2378_s4 = inlined_call_operand.vmem [shape: f32[2,1], index: 4, kind: input, shape index: {}]   ;;  %s2379_s5 = inlined_call_operand.vmem [shape: f32[16,16], index: 5, kind: input, shape index: {}]   ;;  %s2380_s6 = inlined_call_operand.vmem [shape: f32[16,1], index: 6, kind: input, shape index: {}]   ;;  %s2381_s7 = inlined_call_operand.hbm [shape: f32[2,16,256], index: 7, kind: input, shape index: {}]   ;;  %s2382_s8 = inlined_call_operand.hbm [shape: f32[2,16,256], index: 8, kind: input, shape index: {}]   ;;  %s2383_s9 = inlined_call_operand.hbm [shape: f32[2,16,256], index: 9, kind: output, shape index: {}]  }
   0x1   :  { %2403 = sst [smem:[#allocation26_spill]] %s2375_s1 }
   0x2   :  { %2404 = sst [smem:[#allocation27_spill]] %s2379_s5 }
   0x3   :  { %2405 = sst [smem:[#allocation28_spill]] %s2380_s6 }
   0x4   :  { %2406 = sst [smem:[#allocation29_spill]] %s2381_s7 }
   0x5   :  { %2407 = sst [smem:[#allocation30_spill]] %s2383_s9 }
   0x6   :  { %14 = sst [smem:[#allocation7]] %s2374_s0 }
   0x7   :  { %15 = vsyncpa [#allocation9], 0 }
   0x8   :  { %17 = vsyncpa [#allocation9 + $0x1], 0 }
   0x9   :  { %18 = vsyncpa [#allocation12], 0 }
   0xa   :  { %20 = vsyncpa [#allocation12 + $0x1], 0 }
   0xb   :  { %21 = vsyncpa [#allocation10], 0 }
   0xc   :  { %23 = vsyncpa [#allocation10 + $0x1], 0  ;;  %s1912_s11 = smov 0   ;;  %s1914_s12 = smov 0  }
   0xd   :  { %s1916_s13 = smov 0   ;;  %s1918_s14 = smov 0  }
   0xe   :  { %s1920_s15 = smov 0   ;;  %s1922_s16 = smov 0  }
   0xf   :  { %s1924_s17 = smov 0   ;;  %s1926_s0 = smov 0  }
  0x10   :  { %s1928_s18 = smov 0   ;;  %s1930_s19 = smov 0  }
  0x11   :  { %s1932_s20 = smov 0   ;;  %s1934_s21 = smov 0  }
  0x12   :  { %s1936_s22 = smov 0  }
  0x13 LB: > { %2408 = sst [smem:[#allocation17_spill]] %s1803_s14  ;;  %s1249_s23 = sadd.s32 4294967295, %s1839_s22   ;;  %s1839_s22 = sphi %s1936_s22, %s29_s22   ;;  %s1835_s21 = sphi %s1934_s21, %s2466_s21   ;;  %s1831_s20 = sphi %s1932_s20, %s2456_s20   ;;  %s1827_s19 = sphi %s1930_s19, %s2455_s19   ;;  %s1823_s18 = sphi %s1928_s18, %s2465_s18   ;;  %s1819_s0 = sphi %s1926_s0, %s2454_s0   ;;  %s1815_s17 = sphi %s1924_s17, %s2453_s17   ;;  %s1811_s16 = sphi %s1922_s16, %s2464_s16   ;;  %s1807_s15 = sphi %s1920_s15, %s2463_s15   ;;  %s1803_s14 = sphi %s1918_s14, %s2462_s14   ;;  %s1799_s13 = sphi %s1916_s13, %s2461_s13   ;;  %s1795_s12 = sphi %s1914_s12, %s2460_s12   ;;  %s1791_s11 = sphi %s1912_s11, %s2459_s11  }
  0x14   : > { %2409 = sst [smem:[#allocation18_spill]] %s1819_s0  ;;  %s1250_s24 = sadd.s32 4294967294, %s1839_s22  }
  0x15   : > { %2410 = sst [smem:[#allocation19_spill]] %s1823_s18  ;;  %p190_p0 = scmp.ne.s32.totalorder %s1811_s16, %s1807_s15 }
  0x16   : > { %2411 = sst [smem:[#allocation20_spill]] %s1827_s19  ;;  %p2390_p1 = scmp.eq.s32.totalorder %s1839_s22, 0 }
  0x17   : > { %2412 = sst [smem:[#allocation21_spill]] %s1831_s20  ;;  %p196_p2 = scmp.ne.s32.totalorder %s1807_s15, %s1803_s14 }
  0x18   : > { %p1986_p3 = scmp.eq.s32.totalorder %s1249_s23, 0  ;;  %p250_p4 = scmp.eq.s32.totalorder %s1249_s23, 7 }
  0x19   : > { %p1992_p5 = por %p2390_p1, %p190_p0  ;;  %p256_p6 = scmp.eq.s32.totalorder %s1250_s24, 7 }
  0x1a   : > { %p1998_p7 = por %p1986_p3, %p196_p2  ;;  %p2002_p8 = por %p250_p4, %p190_p0 }
  0x1b   : > { %p2006_p9 = por %p256_p6, %p196_p2  ;;  %p2389_p10 = scmp.lt.s32.totalorder %s1839_s22, 8 }
  0x1c   : > { %s2415_s29 = scalar_select %p1998_p7, 1, 0 }
  0x1d   : > { %s2416_s30 = scalar_select %p2002_p8, 1, 0 }
  0x1e   : > { %s2418_s10 = scalar_select %p2006_p9, 1, 0 }
  0x1f   : > { %2417 = sst [smem:[#allocation22_spill]] %s2416_s30  ;;  %s294_s23 = sand.u32 1, %s1811_s16  }
  0x20   : > { %2419 = sst [smem:[#allocation23_spill]] %s2418_s10  ;;  %s1253_s26 = sshll.u32 %s294_s23, 4 }
  0x21   : > { %s1254_s25 = sshll.u32 %s1835_s21, 2  ;;  %s298_s24 = scalar_lea.vmem [#allocation8], %s1253_s26 }
  0x22   : > { %s303_s14 = sadd.s32 %s1831_s20, %s1254_s25  ;;  %s306_s9 = sshll.u32 %s298_s24, 4  ;;  %s2016_s9 = int_to_ptr.vmem [resolvable:$true] %s306_s9 }
  0x23   : > { %s1255_s0 = sshll.u32 %s303_s14, 7  ;;  %s2420_s7 = sld [smem:[#allocation29_spill]] }
  0x24   : > { %p2027_p11 = pnand %p2389_p10, %p1992_p5  ;;  %s2031_s14 = scalar_lea.sflag [#allocation9], %s294_s23 }
  0x26   : > { %p1639_p13 = pneg %p2027_p11 }
  0x29   : > { %s2021_s5 = scalar_lea.hbm %s2420_s7, %s1255_s0  ;;  %s1642_s18 = scalar_lea.hbm %s2420_s7, 1024 }
  0x2a   : > { %s1637_s26 = scalar_lea.hbm %s2021_s5, 256  ;;  %p1643_p4 = scmp.lt.u32.totalorder %s2021_s5, %s2420_s7 }
  0x2b   : > { %p1638_p12 = scmp.ne.s32.totalorder %s2021_s5, %s1637_s26  ;;  %p1644_p5 = scmp.lt.u32.totalorder %s1642_s18, %s1637_s26 }
  0x2c   : > { %p1646_p10 = scmp.lt.u32.totalorder %s1637_s26, %s2021_s5 }
  0x2d   : > { %p1640_p0 = pnand %p1639_p13, %p1638_p12  ;;  %p1645_p6 = por %p1644_p5, %p1643_p4 }
  0x2f   : > { %p1641_p2 = pneg %p1640_p0  ;;  %p1647_p1 = por %p1646_p10, %p1645_p6 }
  0x31   : > { %p1648_p9 = pnand %p1647_p1, %p1641_p2 }
  0x33   : > { %1651 = shalt.err (!%p1648_p9)
}
  0x34   : > { %s1652_s23 = scalar_lea.vmem %s2016_s9, 256  ;;  %s1841_s6 = smov [#allocation8]  }
  0x35   : > { %p1653_p12 = scmp.ne.s32.totalorder %s2016_s9, %s1652_s23  ;;  %s1657_s0 = sshll.u32 %s1841_s6, 4  ;;  %s1658_s0 = int_to_ptr.vmem [resolvable:$false] %s1657_s0 }
  0x36   : > { %s1659_s28 = scalar_lea.vmem %s1658_s0, 512  ;;  %p1660_p7 = scmp.lt.s32.totalorder %s2016_s9, %s1658_s0 }
  0x37   : > { %p1655_p0 = pnand %p1653_p12, %p1639_p13  ;;  %p1661_p4 = scmp.lt.s32.totalorder %s1659_s28, %s1652_s23 }
  0x39   : > { %p1656_p8 = pneg %p1655_p0  ;;  %p1662_p5 = por %p1661_p4, %p1660_p7 }
  0x3b   : > { %p1663_p10 = pnand %p1662_p5, %p1656_p8 }
  0x3d   : > { %1666 = shalt.err (!%p1663_p10)
}
  0x3e   : > { %s2393_s26 = smov 256   ;;  %s2394_s18 = smov 128  }
  0x3f   : > { %s2395_s24 = smov 8   ;;  %p1259_p1 = scmp.ge.s32.totalorder %s1839_s22, 1 }
  0x40   : > { %1469 = dma.hbm_to_vmem [thread:$0]  (!%p2027_p11), %s2021_s5, 256, %s2016_s9, %s2031_s14, %s2393_s26, %s2394_s18, %s2395_s24  }
  0x41   : > { %p336_p7 = scmp.lt.s32.totalorder %s1839_s22, 9  ;;  %s41_s0 = sadd.s32 1, %s1827_s19 }
  0x42   : > { %p42_p9 = scmp.ge.s32.totalorder %s41_s0, 2  ;;  %p224_p13 = scmp.ne.s32.totalorder %s1795_s12, %s1791_s11 }
  0x43   : > { %p2065_p8 = pnand %p1259_p1, %p336_p7  ;;  %s2424_s5 = sadd.s32 1, %s1831_s20 }
  0x44   : > { %s2468_s0 = smov (%p42_p9, %s41_s0), 0  ;;  %s2470_s5 = smov (!%p42_p9, %s2424_s5), %s1831_s20 }
  0x45   : > { %2423 = sst [smem:[#allocation24_spill]] %s2468_s0  ;;  %s207_s9 = ssub.s32 %s1827_s19, %s2468_s0 }
  0x46   : > { %p218_p11 = scmp.ne.s32.totalorder %s1799_s13, %s1795_s12  ;;  %p46_p2 = scmp.ge.s32.totalorder %s2470_s5, 2 }
  0x47   : > { %p2084_p6 = por %p224_p13, %p1986_p3  ;;  %s316_s28 = sand.u32 1, %s1799_s13  }
  0x48   : > { %s325_s26 = sadd.s32 %s1827_s19, %s1254_s25  ;;  %s2472_s5 = smov (%p46_p2, %s2470_s5), 0 }
  0x49   : > { %s2425_s14 = scalar_select %p2084_p6, 1, 0 }
  0x4a   : > { %2426 = sst [smem:[#allocation25_spill]] %s2472_s5  ;;  %s2427_s11 = sadd.s32 1, %s1835_s21 }
  0x4b   : > { %s2474_s11 = smov (!%p46_p2, %s2427_s11), %s1835_s21  ;;  %s179_s18 = ssub.s32 %s1831_s20, %s2472_s5 }
  0x4c   : > { %p2428_p12 = scmp.eq.s32.totalorder %s1839_s22, 0  ;;  %p50_p3 = scmp.ge.s32.totalorder %s2474_s11, 2 }
  0x4d   : > { %s1256_s27 = sshll.u32 %s316_s28, 4  ;;  %s1258_s25 = sshll.u32 %s325_s26, 7 }
  0x4e   : > { %p2101_p0 = por %p218_p11, %p2428_p12  ;;  %s2476_s11 = smov (%p50_p3, %s2474_s11), 0 }
  0x4f   : > { %s2110_s7 = scalar_lea.hbm %s2382_s8, %s1258_s25  ;;  %s178_s5 = ssub.s32 %s1835_s21, %s2476_s11 }
  0x50   : > { %s320_s0 = scalar_lea.vmem [#allocation11], %s1256_s27  ;;  %s180_s19 = sor.u32 %s179_s18, %s178_s5 }
  0x51   : > { %s328_s20 = sshll.u32 %s320_s0, 4  ;;  %s208_s30 = sor.u32 %s207_s9, %s178_s5  ;;  %s2114_s20 = int_to_ptr.vmem [resolvable:$true] %s328_s20 }
  0x52   : > { %p181_p4 = scmp.eq.s32.totalorder %s180_s19, 0  ;;  %p209_p5 = scmp.eq.s32.totalorder %s208_s30, 0 }
  0x53   : > { %p2430_p10 = scmp.lt.s32.totalorder %s1839_s22, 8  ;;  %s2432_s23 = sadd.s32 1, %s1811_s16 }
  0x54   : > { %s2127_s10 = scalar_select %p181_p4, %s1811_s16, %s2432_s23  }
  0x55   : > { %p2120_p1 = pnand %p2430_p10, %p2101_p0  ;;  %s2433_s0 = sadd.s32 1, %s1799_s13 }
  0x56   : > { %s2132_s27 = scalar_select %p209_p5, %s1799_s13, %s2433_s0  }
  0x57   : > { %s2134_s18 = scalar_lea.sflag [#allocation12], %s316_s28  ;;  %s1667_s19 = scalar_lea.hbm %s2110_s7, 256 }
  0x58   : > { %p1668_p7 = scmp.ne.s32.totalorder %s2110_s7, %s1667_s19  ;;  %p1669_p9 = pneg %p2120_p1 }
  0x59   : > { %s1672_s5 = scalar_lea.hbm %s2382_s8, 1024  ;;  %p1673_p2 = scmp.lt.u32.totalorder %s2110_s7, %s2382_s8 }
  0x5a   : > { %p1670_p13 = pnand %p1669_p9, %p1668_p7  ;;  %p1674_p12 = scmp.lt.u32.totalorder %s1672_s5, %s1667_s19 }
  0x5b   : > { %p1676_p3 = scmp.lt.u32.totalorder %s1667_s19, %s2110_s7 }
  0x5c   : > { %p1671_p11 = pneg %p1670_p13  ;;  %p1675_p0 = por %p1674_p12, %p1673_p2 }
  0x5e   : > { %p1677_p4 = por %p1676_p3, %p1675_p0 }
  0x60   : > { %p1678_p5 = pnand %p1677_p4, %p1671_p11 }
  0x62   : > { %1681 = shalt.err (!%p1678_p5)
}
  0x63   : > { %s1682_s28 = scalar_lea.vmem %s2114_s20, 256  ;;  %s1845_s23 = smov [#allocation11]  }
  0x64   : > { %p1683_p10 = scmp.ne.s32.totalorder %s2114_s20, %s1682_s28  ;;  %s1687_s0 = sshll.u32 %s1845_s23, 4  ;;  %s1688_s0 = int_to_ptr.vmem [resolvable:$false] %s1687_s0 }
  0x65   : > { %s1689_s30 = scalar_lea.vmem %s1688_s0, 512  ;;  %p1690_p6 = scmp.lt.s32.totalorder %s2114_s20, %s1688_s0 }
  0x66   : > { %p1685_p7 = pnand %p1683_p10, %p1669_p9  ;;  %p1691_p2 = scmp.lt.s32.totalorder %s1689_s30, %s1682_s28 }
  0x68   : > { %p1686_p13 = pneg %p1685_p7  ;;  %p1692_p12 = por %p1691_p2, %p1690_p6 }
  0x6a   : > { %p1693_p0 = pnand %p1692_p12, %p1686_p13 }
  0x6c   : > { %1696 = shalt.err (!%p1693_p0)
}
  0x6d   : > { %s2434_s19 = smov 8   ;;  %s2435_s24 = smov 128  }
  0x6e   : > { %s2436_s5 = smov 256   ;;  %340 = sbr.rel (%p2065_p8) target bundleno = 1306 (0x51a), region = 52 }
  0x6f   : > { %1472 = dma.hbm_to_vmem [thread:$0]  (!%p2120_p1), %s2110_s7, 256, %s2114_s20, %s2134_s18, %s2436_s5, %s2435_s24, %s2434_s19  }
  0x70   : > { %s2168_s9 = sand.u32 (!%p2065_p8), 1, %s1807_s15   ;;  %p2437_p6 = scmp.ne.s32.totalorder (!%p2065_p8), %s2415_s29, 0 }
  0x71   : > { %s1260_s25 = sshll.u32 (!%p2065_p8), %s2168_s9, 4  ;;  %s343_s28 = scalar_lea.sflag (!%p2065_p8), [#allocation9], %s2168_s9 }
  0x72   : > { %s2172_s23 = scalar_lea.vmem (!%p2065_p8), [#allocation8], %s1260_s25 }
  0x75   : > { %1778 = dma.done.wait (%p2437_p6), %s343_s28, 256  }
  0x76   : > { %1780 = vsyncadd (%p2437_p6), %s343_s28, 4294967040  ;;  %s351_s7 = sand.u32 1, %s1795_s12   ;;  %p2438_p8 = scmp.ne.s32.totalorder %s2425_s14, 0 }
  0x77   : > { %s2179_s20 = sshll.u32 %s351_s7, 4  ;;  %s352_s6 = scalar_lea.sflag [#allocation12], %s351_s7 }
  0x78   : > { %s355_s26 = scalar_lea.vmem [#allocation11], %s2179_s20 }
  0x79   : > { %1782 = dma.done.wait (%p2438_p8), %s352_s6, 256  }
  0x7a   : > { %1784 = vsyncadd (%p2438_p8), %s352_s6, 4294967040  ;;  %s2186_s18 = scalar_lea.vmem [#allocation13], %s1260_s25  ;;  %p1263_p1 = scmp.ne.s32.totalorder %s1815_s17, 0 }
  0x7b   : > { %v397_v0 = vld [vmem:[%s2172_s23] sm:$0xff] (!%p1263_p1)  ;;  %v398_v1 = vld [vmem:[%s2172_s23 + $0x8] sm:$0xff] (!%p1263_p1)  ;;  %v1846_v2 = vmov (!%p1263_p1), 0.0|0.0   ;;  %vm1847_vm0 = vmmov (!%p1263_p1), 0   ;;  %v1848_v4 = vmov (!%p1263_p1), 0.0   ;;  %v1849_v6 = vmov (!%p1263_p1), 0  }
  0x7c   : > { %396 = sbr.rel (%p1263_p1) target bundleno = 347 (0x15b), region = 64  ;;  %1418 = vmatprep.subr.bf16.mxu0 (!%p1263_p1), %v1846_v2  ;;  %v1419_v3 = vpack.c.bf16 (!%p1263_p1), %v398_v1, %v397_v0  ;;  %1340 = vmatprep.mubr.msk.f32.mxu0 (!%p1263_p1), %vm1847_vm0, %v1848_v4  ;;  %482 = vst [vmem:[#allocation4] sm:$0x1] (!%p1263_p1), %v1848_v4  ;;  %483 = vst [vmem:[#allocation5] sm:$0xff] (!%p1263_p1), %v1848_v4  ;;  %v400_v5 = vld [vmem:[%s2376_s2] sm:$0x3] (!%p1263_p1) }
  0x7d   : > { %484 = vst [vmem:[#allocation5 + $0x8] sm:$0xff] (!%p1263_p1), %v1848_v4  ;;  %1598 = vset.pattern.permute.xlu0 (!%p1263_p1), %v1849_v6  ;;  %s2439_s1 = sld [smem:[#allocation26_spill]] (!%p1263_p1)  ;;  %vm406_vm1 = vcmask (!%p1263_p1), 130048   ;;  %v1850_v8 = vmov (!%p1263_p1), -1e+30  }
  0x7e   : > { %1420 = vmatpush3.bf16.msra.mxu0 (!%p1263_p1), %v1419_v3  ;;  %403 = vperm.xlu0 (!%p1263_p1), %1598, %v400_v5   ;;  %481 = vst [vmem:[#allocation3] sm:$0x1] (!%p1263_p1), %v1850_v8 }
  0x83   : > { %v399_v7 = vld [vmem:[%s2439_s1] sm:$0x3] }
  0x84   : > { %1341 = vmatmul.mubr.msk.f32.vlgmr.msra.gmra.mrb[0].mxu0 %vm406_vm1, %v399_v7 }
  0xfd   : > { %v404_v9 = vpop.permute.xlu0 %403 }
 0x157   : > { %v476_v10 = vpop.f32.mrb[0].mxu0 }
 0x158   : > { %v477_v11 = vadd.f32 %v476_v10, %v404_v9  ;;  %v1342_v12 = vpop.f32.mrb[1].mxu0 }
 0x15a   : > { %480 = vst [vmem:[#allocation2] sm:$0x3] %v477_v11 }
 0x15b PF: > { %v485_v13 = vld [vmem:[%s355_s26] sm:$0xff]  ;;  %v486_v14 = vld [vmem:[%s355_s26 + $0x8] sm:$0xff]  ;;  %v1851_v15 = vmov 0.0|0.0   ;;  %vm1852_vm2 = vmmov 0   ;;  %v1853_v17 = vmov 0.0   ;;  %v1854_v19 = vmov 0  }
 0x15c   : > { %1421 = vmatprep.subr.bf16.mxu0 %v1851_v15  ;;  %v1422_v16 = vpack.c.bf16 %v486_v14, %v485_v13  ;;  %1347 = vmatprep.mubr.msk.f32.mxu0 %vm1852_vm2, %v1853_v17  ;;  %v488_v18 = vld [vmem:[%s2378_s4] sm:$0x3]  ;;  %vm494_vm3 = vcmask 130048   ;;  %vm745_vm4 = vcmask 1041408   ;;  %s2440_s20 = sld [smem:[#allocation27_spill]]  ;;  %s2442_s30 = sld [smem:[#allocation28_spill]] }
 0x15d   : > { %1599 = vset.pattern.permute.xlu0 %v1854_v19  ;;  %1600 = vset.pattern.permute.xlu1 %v1854_v19  ;;  %v487_v20 = vld [vmem:[%s2377_s3] sm:$0x3]  ;;  %vm696_vm5 = vcmask 15360   ;;  %v921_v19 = vlaneseq  ;;  %p1285_p9 = scmp.ne.s32.totalorder %s1815_s17, 1 }
 0x15e   : > { %1423 = vmatpush3.bf16.msra.mxu0 %v1422_v16  ;;  %491 = vperm.xlu0 %1599, %v488_v18   ;;  %s1105_s5 = sld [smem:[#allocation7]] (!%p1285_p9) }
 0x15f   : > { %1425 = vmatprep.subr.bf16.mxu1 %v1422_v16 }
 0x160   : > { %1427 = vmatpush3.bf16.msra.mxu1 %v1422_v16 }
 0x161   : > { %1348 = vmatmul.mubr.msk.f32.vlgmr.msra.gmra.mrb[0].mxu0 %vm494_vm3, %v487_v20  ;;  %v663_v25 = vld [vmem:[#allocation2] sm:$0x3] }
 0x162   : > { %1357 = vmatprep.subr.msk.mxu0 %vm745_vm4, %v663_v25  ;;  %s2441_s6 = smov %s2440_s20  ;;  %v568_v26 = vld [vmem:[%s2440_s20] sm:$0xff]  ;;  %v571_v29 = vld [vmem:[%s2442_s30 + $0x8] sm:$0xff] }
 0x163   : > { %1358 = vmatpush3.msk.msra.mxu0 %vm745_vm4, %v663_v25  ;;  %v569_v27 = vld [vmem:[%s2441_s6 + $0x8] sm:$0xff]  ;;  %v570_v28 = vld [vmem:[%s2442_s30] sm:$0xff]  ;;  %1354 = vmatprep.mubr.msk.f32.mxu1 %vm494_vm3, %v568_v26 }
 0x164   : > { %574 = vperm.xlu1 %1600, %v570_v28   ;;  %1355 = vmatmul.mubr.msk.f32.vlgmr.msra.gmra.mrb[0].mxu1 %vm494_vm3, %v569_v27 }
 0x168   : > { %579 = vperm.xlu1 %1600, %v571_v29  }
 0x1dd   : > { %v492_v21 = vpop.permute.xlu0 %491 }
 0x1e3   : > { %v575_v51 = vpop.permute.xlu1 %574 }
 0x234   : > { %v564_v22 = vpop.f32.mrb[0].mxu0 }
 0x235   : > { %v565_v23 = vadd.f32 %v564_v22, %v492_v21  ;;  %v1349_v24 = vpop.f32.mrb[1].mxu0  ;;  %v922_v22 = vshrl.u32 %v921_v19, 7 }
 0x236   : > { %v894_v24 = vld [vmem:[#allocation3] sm:$0x1] }
 0x237   : > { %664 = vxpose.xlu0.b32.start.end [1/1] (short) %v565_v23, 128  ;;  %v2246_v50 = vpop.f32.mrb[0].mxu1  ;;  %v2270_v26 = vsub.s32 0, %v922_v22 }
 0x238   : > { %v654_v52 = vpop.f32.mrb[1].mxu1 }
 0x239   : > { %v655_v53 = vadd.f32 %v654_v52, %v575_v51 }
 0x23b   : > { %1415 = vmatprep.mubr.f32.mxu1 %v655_v53 }
 0x2b7   : > { %v680_v30 = vpop.trf.xlu0 }
 0x2b8   : > { %1359 = vmatprep.mubr.msk.f32.mxu0 %vm696_vm5, %v680_v30 }
 0x2bb   : > { %v681_v31 = vpop.trf.xlu0 }
 0x2bc   : > { %1360 = vmatmul.mubr.msk.f32.vlgmr.msra.gmra.mrb[2].mxu0 %vm696_vm5, %v681_v31 }
 0x2bf   : > { %v682_v32 = vpop.trf.xlu0 }
 0x2c0   : > { %1362 = vmatprep.mubr.msk.f32.mxu0 %vm696_vm5, %v682_v32 }
 0x2c3   : > { %v683_v33 = vpop.trf.xlu0 }
 0x2c4   : > { %1363 = vmatmul.mubr.msk.f32.gmra.mrb[4].mxu0 %vm696_vm5, %v683_v33 }
 0x2c7   : > { %v684_v34 = vpop.trf.xlu0 }
 0x2c8   : > { %1365 = vmatprep.mubr.msk.f32.mxu0 %vm696_vm5, %v684_v34 }
 0x2cb   : > { %v685_v35 = vpop.trf.xlu0 }
 0x2cc   : > { %1366 = vmatmul.mubr.msk.f32.gmra.mrb[6].mxu0 %vm696_vm5, %v685_v35 }
 0x2cf   : > { %v686_v36 = vpop.trf.xlu0 }
 0x2d0   : > { %1368 = vmatprep.mubr.msk.f32.mxu0 %vm696_vm5, %v686_v36 }
 0x2d3   : > { %v687_v37 = vpop.trf.xlu0 }
 0x2d4   : > { %1369 = vmatmul.mubr.msk.f32.gmra.mrb[8].mxu0 %vm696_vm5, %v687_v37 }
 0x2d7   : > { %v688_v38 = vpop.trf.xlu0 }
 0x2d8   : > { %1371 = vmatprep.mubr.msk.f32.mxu0 %vm696_vm5, %v688_v38 }
 0x2db   : > { %v689_v39 = vpop.trf.xlu0 }
 0x2dc   : > { %1372 = vmatmul.mubr.msk.f32.gmra.mrb[10].mxu0 %vm696_vm5, %v689_v39 }
 0x2df   : > { %v690_v40 = vpop.trf.xlu0 }
 0x2e0   : > { %1374 = vmatprep.mubr.msk.f32.mxu0 %vm696_vm5, %v690_v40 }
 0x2e3   : > { %v691_v41 = vpop.trf.xlu0 }
 0x2e4   : > { %1375 = vmatmul.mubr.msk.f32.gmra.mrb[12].mxu0 %vm696_vm5, %v691_v41 }
 0x2e7   : > { %v692_v42 = vpop.trf.xlu0 }
 0x2e8   : > { %1377 = vmatprep.mubr.msk.f32.mxu0 %vm696_vm5, %v692_v42 }
 0x2eb   : > { %v693_v43 = vpop.trf.xlu0 }
 0x2ec   : > { %1378 = vmatmul.mubr.msk.f32.gmra.mrb[14].mxu0 %vm696_vm5, %v693_v43 }
 0x2ef   : > { %v694_v44 = vpop.trf.xlu0 }
 0x2f0   : > { %1380 = vmatprep.mubr.msk.f32.mxu0 %vm696_vm5, %v694_v44 }
 0x2f3   : > { %v695_v45 = vpop.trf.xlu0 }
 0x2f4   : > { %1381 = vmatmul.mubr.msk.f32.gmra.mrb[16].mxu0 %vm696_vm5, %v695_v45 }
 0x38f   : > { %v2238_v46 = vpop.f32.mrb[2].mxu0 }
 0x390   : > { %v2240_v47 = vpop.f32.mrb[3].mxu0 }
 0x397   : > { %v2242_v48 = vpop.f32.mrb[4].mxu0 }
 0x398   : > { %v2244_v49 = vpop.f32.mrb[5].mxu0 }
 0x39f   : > { %v2248_v54 = vpop.f32.mrb[6].mxu0 }
 0x3a0   : > { %v896_v55 = vmax.f32 %v2238_v46, %v2248_v54  ;;  %v835_v56 = vpop.f32.mrb[7].mxu0 }
 0x3a1   : > { %v895_v57 = vmax.f32 %v2240_v47, %v835_v56 }
 0x3a7   : > { %v2253_v58 = vpop.f32.mrb[8].mxu0 }
 0x3a8   : > { %v898_v59 = vmax.f32 %v2242_v48, %v2253_v58  ;;  %v845_v60 = vpop.f32.mrb[9].mxu0 }
 0x3a9   : > { %v897_v61 = vmax.f32 %v2244_v49, %v845_v60 }
 0x3af   : > { %v2258_v62 = vpop.f32.mrb[10].mxu0 }
 0x3b0   : > { %v900_v63 = vmax.f32 %v896_v55, %v2258_v62  ;;  %v855_v0 = vpop.f32.mrb[11].mxu0 }
 0x3b1   : > { %v899_v1 = vmax.f32 %v895_v57, %v855_v0 }
 0x3b7   : > { %v2261_v2 = vpop.f32.mrb[12].mxu0 }
 0x3b8   : > { %v902_v3 = vmax.f32 %v898_v59, %v2261_v2  ;;  %v865_v4 = vpop.f32.mrb[13].mxu0 }
 0x3b9   : > { %v901_v5 = vmax.f32 %v897_v61, %v865_v4 }
 0x3bf   : > { %v2264_v6 = vpop.f32.mrb[14].mxu0 }
 0x3c0   : > { %v904_v7 = vmax.f32 %v900_v63, %v2264_v6  ;;  %v875_v8 = vpop.f32.mrb[15].mxu0 }
 0x3c1   : > { %v903_v9 = vmax.f32 %v899_v1, %v875_v8 }
 0x3c3   : > { %v907_v10 = vmax.f32 %v903_v9, %v904_v7 }
 0x3c7   : > { %v2267_v11 = vpop.f32.mrb[16].mxu0 }
 0x3c8   : > { %v906_v12 = vmax.f32 %v902_v3, %v2267_v11  ;;  %v885_v13 = vpop.f32.mrb[17].mxu0 }
 0x3c9   : > { %v905_v14 = vmax.f32 %v901_v5, %v885_v13 }
 0x3cb   : > { %v908_v15 = vmax.f32 %v905_v14, %v906_v12 }
 0x3cd   : > { %v909_v16 = vmax.f32 %v907_v10, %v908_v15 }
 0x3cf   : > { %v910_v17 = vrot.slane %v909_v16, 4 }
 0x3d1   : > { %v911_v18 = vmax.f32 %v909_v16, %v910_v17 }
 0x3d3   : > { %v912_v20 = vrot.slane %v911_v18, 2 }
 0x3d5   : > { %v913_v21 = vmax.f32 %v911_v18, %v912_v20 }
 0x3d7   : > { %v914_v23 = vrot.slane %v913_v21, 1 }
 0x3d9   : > { %v915_v25 = vmax.f32 %v913_v21, %v914_v23 }
 0x3db   : > { %v916_v27 = vmax.f32 %v894_v24, %v915_v25 }
 0x3dd   : > { %v924_v28 = vrot.slane %v916_v27, %v2270_v26  ;;  %1088 = vst [vmem:[#allocation3] sm:$0x1] %v916_v27  ;;  %v917_v59 = vsub.f32 %v894_v24, %v916_v27 }
 0x3df   : > { %v926_v29 = vsub.f32 %v2240_v47, %v924_v28  ;;  %v927_v30 = vsub.f32 %v2238_v46, %v924_v28  ;;  %v928_v31 = vsub.f32 %v2244_v49, %v924_v28  ;;  %v929_v32 = vsub.f32 %v2242_v48, %v924_v28 }
 0x3e0   : > { %v930_v33 = vsub.f32 %v835_v56, %v924_v28  ;;  %v931_v34 = vsub.f32 %v2248_v54, %v924_v28  ;;  %v932_v35 = vsub.f32 %v845_v60, %v924_v28  ;;  %v933_v36 = vsub.f32 %v2253_v58, %v924_v28 }
 0x3e1   : > { %v934_v37 = vsub.f32 %v855_v0, %v924_v28  ;;  %v935_v38 = vsub.f32 %v2258_v62, %v924_v28  ;;  %v936_v39 = vsub.f32 %v865_v4, %v924_v28  ;;  %v937_v40 = vsub.f32 %v2261_v2, %v924_v28 }
 0x3e2   : > { %v938_v41 = vsub.f32 %v875_v8, %v924_v28  ;;  %v939_v42 = vsub.f32 %v2264_v6, %v924_v28  ;;  %v940_v43 = vsub.f32 %v885_v13, %v924_v28  ;;  %v941_v44 = vsub.f32 %v2267_v11, %v924_v28 }
 0x3e3   : > { %v942_v45 = vmul.f32 1.442695, %v926_v29  ;;  %v944_v46 = vmul.f32 1.442695, %v927_v30  ;;  %v946_v47 = vmul.f32 1.442695, %v928_v31 }
 0x3e4   : > { %v948_v48 = vmul.f32 1.442695, %v929_v32  ;;  %v950_v49 = vmul.f32 1.442695, %v930_v33  ;;  %v952_v51 = vmul.f32 1.442695, %v931_v34 }
 0x3e5   : > { %1601 = vpow2.f32 %v942_v45  ;;  %v954_v52 = vmul.f32 1.442695, %v932_v35  ;;  %v956_v53 = vmul.f32 1.442695, %v933_v36  ;;  %v958_v54 = vmul.f32 1.442695, %v934_v37 }
 0x3e6   : > { %1603 = vpow2.f32 %v944_v46  ;;  %v960_v55 = vmul.f32 1.442695, %v935_v38  ;;  %v962_v56 = vmul.f32 1.442695, %v936_v39  ;;  %v964_v57 = vmul.f32 1.442695, %v937_v40 }
 0x3e7   : > { %1605 = vpow2.f32 %v946_v47  ;;  %v966_v58 = vmul.f32 1.442695, %v938_v41  ;;  %v968_v60 = vmul.f32 1.442695, %v939_v42  ;;  %v970_v62 = vmul.f32 1.442695, %v940_v43  ;;  %v580_v42 = vpop.permute.xlu1 %579 }
 0x3e8   : > { %1607 = vpow2.f32 %v948_v48  ;;  %v972_v0 = vmul.f32 1.442695, %v941_v44  ;;  %v918_v4 = vmul.f32 1.442695, %v917_v59  ;;  %v660_v45 = vadd.f32 %v2246_v50, %v580_v42  ;;  %v974_v48 = vld [vmem:[#allocation4] sm:$0x1] }
 0x3e9   : > { %1609 = vpow2.f32 %v950_v49 }
 0x3ea   : > { %1611 = vpow2.f32 %v952_v51 }
 0x3eb   : > { %1613 = vpow2.f32 %v954_v52 }
 0x3ec   : > { %1615 = vpow2.f32 %v956_v53 }
 0x3ed   : > { %1617 = vpow2.f32 %v958_v54  ;;  %v1000_v54 = vld [vmem:[#allocation5 + $0x8] sm:$0xff] }
 0x3ee   : > { %1619 = vpow2.f32 %v960_v55  ;;  %v999_v55 = vld [vmem:[#allocation5] sm:$0xff] }
 0x3ef   : > { %v1602_v61 = vpop.eup %1601  ;;  %1621 = vpow2.f32 %v962_v56 }
 0x3f0   : > { %v1604_v63 = vpop.eup %1603  ;;  %1623 = vpow2.f32 %v964_v57 }
 0x3f1   : > { %v1606_v1 = vpop.eup %1605  ;;  %1625 = vpow2.f32 %v966_v58  ;;  %v976_v2 = vadd.f32 %v1604_v63, %v1602_v61  ;;  %v1428_v3 = vpack.c.bf16 %v1604_v63, %v1602_v61 }
 0x3f2   : > { %v1608_v5 = vpop.eup %1607  ;;  %1627 = vpow2.f32 %v968_v60 }
 0x3f3   : > { %v1610_v6 = vpop.eup %1609  ;;  %1629 = vpow2.f32 %v970_v62  ;;  %v977_v7 = vadd.f32 %v1606_v1, %v976_v2  ;;  %1429 = vmatprep.subr.bf16.mxu1 %v1428_v3  ;;  %v1432_v8 = vpack.c.bf16 %v1608_v5, %v1606_v1  ;;  %v1106_v2 = vstv (!%p1285_p9), %s1105_s5 }
 0x3f4   : > { %v1612_v9 = vpop.eup %1611  ;;  %1631 = vpow2.f32 %v972_v0  ;;  %1431 = vmatpush3.bf16.msra.mxu1 %v1428_v3 }
 0x3f5   : > { %v1614_v10 = vpop.eup %1613  ;;  %v978_v11 = vadd.f32 %v1608_v5, %v977_v7  ;;  %1433 = vmatprep.subr.bf16.mxu1 %v1432_v8  ;;  %v1436_v12 = vpack.c.bf16 %v1612_v9, %v1610_v6  ;;  %1633 = vpow2.f32 %v918_v4  ;;  %v1109_v5 = vld [vmem:[%s2172_s23] sm:$0xff] (!%p1285_p9) }
 0x3f6   : > { %v1616_v13 = vpop.eup %1615 }
 0x3f7   : > { %v1618_v14 = vpop.eup %1617  ;;  %v979_v15 = vadd.f32 %v1610_v6, %v978_v11  ;;  %v1440_v16 = vpack.c.bf16 %v1616_v13, %v1614_v10  ;;  %v1110_v6 = vld [vmem:[%s2172_s23 + $0x8] sm:$0xff] (!%p1285_p9) }
 0x3f8   : > { %v1620_v17 = vpop.eup %1619  ;;  %1435 = vmatpush3.bf16.msra.mxu1 %v1432_v8 }
 0x3f9   : > { %v1622_v18 = vpop.eup %1621  ;;  %v980_v19 = vadd.f32 %v1612_v9, %v979_v15  ;;  %1437 = vmatprep.subr.bf16.mxu1 %v1436_v12  ;;  %v1444_v20 = vpack.c.bf16 %v1620_v17, %v1618_v14 }
 0x3fa   : > { %v1624_v21 = vpop.eup %1623 }
 0x3fb   : > { %v1626_v22 = vpop.eup %1625  ;;  %v981_v23 = vadd.f32 %v1614_v10, %v980_v19  ;;  %v1448_v24 = vpack.c.bf16 %v1624_v21, %v1622_v18 }
 0x3fc   : > { %v1628_v25 = vpop.eup %1627  ;;  %1439 = vmatpush3.bf16.msra.mxu1 %v1436_v12 }
 0x3fd   : > { %v1630_v27 = vpop.eup %1629  ;;  %v982_v28 = vadd.f32 %v1616_v13, %v981_v23  ;;  %1441 = vmatprep.subr.bf16.mxu1 %v1440_v16  ;;  %v1452_v29 = vpack.c.bf16 %v1628_v25, %v1626_v22 }
 0x3fe   : > { %v1632_v30 = vpop.eup %1631 }
 0x3ff   : > { %v1634_v31 = vpop.eup %1633  ;;  %v983_v32 = vadd.f32 %v1618_v14, %v982_v28  ;;  %v1456_v33 = vpack.c.bf16 %v1632_v30, %v1630_v27 }
 0x400   : > { %1443 = vmatpush3.bf16.msra.mxu1 %v1440_v16  ;;  %v1005_v34 = vrot.slane %v1634_v31, %v2270_v26  ;;  %v975_v52 = vmul.f32 %v1634_v31, %v974_v48 }
 0x401   : > { %v984_v35 = vadd.f32 %v1620_v17, %v983_v32  ;;  %1445 = vmatprep.subr.bf16.mxu1 %v1444_v20 }
 0x402   : > { %v1008_v56 = vmul.f32 %v1005_v34, %v1000_v54  ;;  %v1007_v58 = vmul.f32 %v1005_v34, %v999_v55 }
 0x403   : > { %v985_v36 = vadd.f32 %v1622_v18, %v984_v35 }
 0x404   : > { %1447 = vmatpush3.bf16.msra.mxu1 %v1444_v20 }
 0x405   : > { %v986_v37 = vadd.f32 %v1624_v21, %v985_v36  ;;  %1449 = vmatprep.subr.bf16.mxu1 %v1448_v24 }
 0x407   : > { %v987_v38 = vadd.f32 %v1626_v22, %v986_v37 }
 0x408   : > { %1451 = vmatpush3.bf16.msra.mxu1 %v1448_v24 }
 0x409   : > { %v988_v39 = vadd.f32 %v1628_v25, %v987_v38  ;;  %1453 = vmatprep.subr.bf16.mxu1 %v1452_v29 }
 0x40b   : > { %v989_v40 = vadd.f32 %v1630_v27, %v988_v39 }
 0x40c   : > { %1455 = vmatpush3.bf16.msra.mxu1 %v1452_v29 }
 0x40d   : > { %v990_v41 = vadd.f32 %v1632_v30, %v989_v40  ;;  %1457 = vmatprep.subr.bf16.mxu1 %v1456_v33 }
 0x40f   : > { %v991_v43 = vrot.slane %v990_v41, 4 }
 0x410   : > { %1459 = vmatpush3.bf16.msra.mxu1 %v1456_v33 }
 0x411   : > { %v992_v44 = vadd.f32 %v991_v43, %v990_v41 }
 0x413   : > { %v993_v46 = vrot.slane %v992_v44, 2  ;;  %1416 = vmatmul.mubr.f32.vlgmr.msra.gmra.mrb[2].mxu1 %v660_v45 }
 0x415   : > { %v994_v47 = vadd.f32 %v993_v46, %v992_v44 }
 0x417   : > { %v995_v49 = vrot.slane %v994_v47, 1 }
 0x419   : > { %v996_v51 = vadd.f32 %v995_v49, %v994_v47 }
 0x41b   : > { %v997_v53 = vadd.f32 %v996_v51, %v975_v52 }
 0x41d   : > { %998 = vst [vmem:[#allocation4] sm:$0x1] %v997_v53 }
 0x424   : > { %v1093_v50 = vld [vmem:[#allocation4] sm:$0x1] (!%p1285_p9) }
 0x425   : > { %1635 = vrcp.f32 (!%p1285_p9), %v1093_v50 }
 0x42f   : > { %v1636_v62 = vpop.eup (!%p1285_p9), %1635 }
 0x430   : > { %v1101_v1 = vrot.slane (!%p1285_p9), %v1636_v62, %v2270_v26 }
 0x4e4   : > { %1092 = sbr.rel (%p1285_p9) target bundleno = 1273 (0x4f9), region = 68 }
 0x4e6   : > { %v1417_v57 = vpop.f32.mrb[2].mxu1 }
 0x4e7   : > { %v1085_v59 = vadd.f32 %v1417_v57, %v1008_v56  ;;  %v1075_v60 = vpop.f32.mrb[3].mxu1 }
 0x4e8   : > { %v1084_v61 = vadd.f32 %v1075_v60, %v1007_v58 }
 0x4e9   : > { %1087 = vst [vmem:[#allocation5 + $0x8] sm:$0xff] %v1085_v59 }
 0x4ea   : > { %1086 = vst [vmem:[#allocation5] sm:$0xff] %v1084_v61 }
 0x4f0   : > { %v1096_v0 = vld [vmem:[#allocation5 + $0x8] sm:$0xff] }
 0x4f1   : > { %v1095_v63 = vld [vmem:[#allocation5] sm:$0xff]  ;;  %v1104_v4 = vmul.f32 %v1101_v1, %v1096_v0 }
 0x4f2   : > { %v1103_v3 = vmul.f32 %v1101_v1, %v1095_v63 }
 0x4f3   : > { %v1108_v8 = vmul.f32 %v1106_v2, %v1104_v4 }
 0x4f4   : > { %v1107_v7 = vmul.f32 %v1106_v2, %v1103_v3 }
 0x4f5   : > { %v1112_v10 = vadd.f32 %v1110_v6, %v1108_v8 }
 0x4f6   : > { %v1111_v9 = vadd.f32 %v1109_v5, %v1107_v7 }
 0x4f7   : > { %1114 = vst [vmem:[%s2186_s18 + $0x8] sm:$0xff] %v1112_v10 }
 0x4f8   : > { %1113 = vst [vmem:[%s2186_s18] sm:$0xff] %v1111_v9 }
 0x4f9 PF: > { %s2443_s17 = sld [smem:[#allocation19_spill]]  ;;  %s2444_s25 = sld [smem:[#allocation18_spill]] }
 0x4fa   : > { %s2445_s28 = sld [smem:[#allocation22_spill]]  ;;  %s1130_s26 = sshll.u32 %s2186_s18, 4  ;;  %s2294_s26 = int_to_ptr.vmem [resolvable:$true] %s1130_s26 }
 0x4fb   : > { %s2446_s0 = sld [smem:[#allocation30_spill]]  ;;  %s1116_s5 = scalar_lea.sflag [#allocation10], %s2168_s9 }
 0x4fc   : > { %s1697_s1 = scalar_lea.vmem %s2294_s26, 256 }
 0x4fd   : > { %p1698_p11 = scmp.ne.s32.totalorder %s2294_s26, %s1697_s1 }
 0x4ff   : > { %s1287_s7 = sshll.u32 %s2443_s17, 2  ;;  %s1855_s17 = smov [#allocation13]  }
 0x500   : > { %s1127_s20 = sadd.s32 %s2444_s25, %s1287_s7  ;;  %p2448_p3 = scmp.ne.s32.totalorder %s2445_s28, 0 }
 0x501   : > { %s1288_s29 = sshll.u32 %s1127_s20, 7  ;;  %s2447_s24 = smov %s2446_s0 }
 0x502   : > { %s2299_s19 = scalar_lea.hbm %s2446_s0, %s1288_s29  ;;  %p1699_p4 = pnand %p1698_p11, %p2448_p3 }
 0x503   : > { %s1701_s25 = sshll.u32 %s1855_s17, 4  ;;  %s1702_s25 = int_to_ptr.vmem [resolvable:$false] %s1701_s25 }
 0x504   : > { %p1700_p5 = pneg %p1699_p4  ;;  %s1703_s18 = scalar_lea.vmem %s1702_s25, 512 }
 0x505   : > { %p1704_p10 = scmp.lt.s32.totalorder %s2294_s26, %s1702_s25  ;;  %p1705_p7 = scmp.lt.s32.totalorder %s1703_s18, %s1697_s1 }
 0x507   : > { %p1706_p13 = por %p1705_p7, %p1704_p10 }
 0x509   : > { %p1707_p2 = pnand %p1706_p13, %p1700_p5 }
 0x50b   : > { %1710 = shalt.err (!%p1707_p2)
}
 0x50c   : > { %s1711_s7 = scalar_lea.hbm %s2299_s19, 256  ;;  %s1715_s14 = scalar_lea.hbm %s2447_s24, 1024 }
 0x50d   : > { %p1712_p12 = scmp.ne.s32.totalorder %s2299_s19, %s1711_s7  ;;  %p1716_p8 = scmp.lt.u32.totalorder %s2299_s19, %s2447_s24 }
 0x50e   : > { %p1717_p1 = scmp.lt.u32.totalorder %s1715_s14, %s1711_s7  ;;  %p1719_p11 = scmp.lt.u32.totalorder %s1711_s7, %s2299_s19 }
 0x50f   : > { %p1713_p0 = pnand %p1712_p12, %p2448_p3 }
 0x510   : > { %p1718_p9 = por %p1717_p1, %p1716_p8 }
 0x511   : > { %p1714_p6 = pneg %p1713_p0 }
 0x512   : > { %p1720_p4 = por %p1719_p11, %p1718_p9 }
 0x514   : > { %p1721_p5 = pnand %p1720_p4, %p1714_p6 }
 0x516   : > { %1724 = shalt.err (!%p1721_p5)
}
 0x517   : > { %s1856_s1 = smov 128   ;;  %s1857_s17 = smov 256  }
 0x518   : > { %s1858_s25 = smov 8  }
 0x519   : > { %1464 = dma.vmem_to_hbm [thread:$0]  (%p2448_p3), %s2294_s26, 256, %s2299_s19, %s1116_s5, %s1856_s1, %s1857_s17, %s1858_s25  }
 0x51a PF: > { %s2449_s18 = sld [smem:[#allocation17_spill]]  ;;  %s2450_s20 = sld [smem:[#allocation23_spill]] }
 0x51b   : > { %p1478_p10 = scmp.ge.s32.totalorder %s1839_s22, 2 }
 0x520   : > { %s1145_s29 = sand.u32 1, %s2449_s18   ;;  %p2451_p7 = scmp.ne.s32.totalorder %s2450_s20, 0 }
 0x521   : > { %s1146_s7 = scalar_lea.sflag [#allocation10], %s1145_s29 }
 0x522   : > { %p1474_p13 = pnand %p1478_p10, %p2451_p7 }
 0x524   : > { %1786 = dma.done.wait (!%p1474_p13), %s1146_s7, 256  }
 0x525   : > { %1788 = vsyncadd (!%p1474_p13), %s1146_s7, 4294967040  ;;  %s29_s22 = sadd.s32 1, %s1839_s22   ;;  %s2453_s17 = sld [smem:[#allocation20_spill]] }
 0x526   : > { %p2330_p2 = scmp.ge.s32.totalorder %s29_s22, 10   ;;  %s2454_s0 = sld [smem:[#allocation21_spill]] }
 0x527   : > { %s2455_s19 = sld [smem:[#allocation24_spill]]  ;;  %s2456_s20 = sld [smem:[#allocation25_spill]] }
 0x528   : > { %s2457_s9 = smov %s2476_s11  ;;  %s2459_s11 = smov %s1795_s12 }
 0x529   : > { %s2460_s12 = smov %s1799_s13  ;;  %s2461_s13 = smov %s2132_s27 }
 0x52a   : > { %s2462_s14 = smov %s1807_s15  ;;  %s2463_s15 = smov %s1811_s16 }
 0x52b   : > { %s2464_s16 = smov %s2127_s10  ;;  %s2465_s18 = smov %s1835_s21 }
 0x52c   : > { %s2466_s21 = smov %s2457_s9  ;;  %28 = sbr.rel (!%p2330_p2) target bundleno = 19 (0x13), region = 118 }
 0x533   :  { %1151 = vsyncpa [#allocation9], 1 }
 0x534   :  { %1153 = vsyncpa [#allocation9 + $0x1], 1 }
 0x535   :  { %1154 = vsyncpa [#allocation12], 1 }
 0x536   :  { %1156 = vsyncpa [#allocation12 + $0x1], 1 }
 0x537   :  { %1157 = vsyncpa [#allocation10], 1 }
 0x538   :  { %1159 = vsyncpa [#allocation10 + $0x1], 1 }

</bundles_post_ra>
